<compile_context>
chip_gen: v7x
topology: tpu7x:2x2x1
jax: 0.10.0
libtpu: 0.0.40
codegen_flags: <defaults>
</compile_context>

<pallas_src>
import functools
import math

import jax
import jax.numpy as jnp
from jax import lax
from jax.experimental import pallas as pl
from jax.experimental.pallas import tpu as pltpu


def _round_up(x, m):
    return (x + m - 1) // m * m


def _vmem_limit_bytes():
    """Scoped-VMEM budget keyed off the actual part (v5e/v6e 128 MiB, v7x 64 MiB)."""
    cap = 64 * 1024 * 1024
    try:
        info = pltpu.get_tpu_info()
        cap = int(getattr(info, "vmem_capacity_bytes", cap))
    except Exception:  # no TPU info available at trace time -> conservative default
        pass
    # Leave ~25% headroom for compiler-internal scratch / in-kernel temporaries.
    return min(int(cap * 3 // 4), 96 * 1024 * 1024)


_VMEM_LIMIT_BYTES = _vmem_limit_bytes()
# Bigger row tiles on 128 MiB parts amortize the ~0.35us/step overhead.
_LINEAR_BLOCK_ROWS = 1024 if _VMEM_LIMIT_BYTES >= 64 * 1024 * 1024 else 512


# ---------------------------------------------------------------------------
# Kernel 1: row-tiled dense layer  y = x @ W + b   (W passed pre-transposed)
# ---------------------------------------------------------------------------
def _linear_kernel(x_ref, w_ref, b_ref, o_ref):
    # Operands stay in their native dtype (bf16 fed straight to the MXU when
    # inputs are bf16); accumulation is f32 via preferred_element_type.
    acc = jnp.dot(x_ref[...], w_ref[...], preferred_element_type=jnp.float32)
    acc = acc + b_ref[...].astype(jnp.float32)          # (1, d_out) broadcasts
    o_ref[...] = acc.astype(o_ref.dtype)


def linear_pallas(x, w_t, b, block_rows=_LINEAR_BLOCK_ROWS):
    """x: (N, d_in), w_t: (d_in, d_out), b: (d_out,) -> (N, d_out)."""
    N, d_in = x.shape
    d_out = w_t.shape[1]

    # Row tile: multiple of the dtype sublane packing (8 f32 / 16 bf16 / 32 i8),
    # capped at block_rows (itself a multiple of 128 -> full MXU M tiles).
    sub = {4: 8, 2: 16, 1: 32}.get(jnp.dtype(x.dtype).itemsize, 8)
    tm = min(block_rows, _round_up(N, sub))
    b2 = b.reshape(1, d_out)

    return pl.pallas_call(
        _linear_kernel,
        out_shape=jax.ShapeDtypeStruct((N, d_out), x.dtype),
        grid_spec=pltpu.PrefetchScalarGridSpec(
            num_scalar_prefetch=0,
            grid=(pl.cdiv(N, tm),),                      # ragged tail masked by Pallas
            in_specs=[
                pl.BlockSpec((tm, d_in), lambda i: (i, 0)),
                pl.BlockSpec((d_in, d_out), lambda i: (0, 0)),  # weight resident
                pl.BlockSpec((1, d_out), lambda i: (0, 0)),     # bias resident
            ],
            out_specs=pl.BlockSpec((tm, d_out), lambda i: (i, 0)),
        ),
        compiler_params=pltpu.CompilerParams(
            dimension_semantics=("parallel",),
            vmem_limit_bytes=_VMEM_LIMIT_BYTES),
    )(x, w_t, b2)


# ---------------------------------------------------------------------------
# Kernel 2: scaled dot-product attention, one (batch, head) pair per grid step.
# Inputs are head-major (3, B, H, S, dh) so each block is a full-extent
# (S, dh) tile; per-head attn-map blocks are pipelined to HBM.
# ---------------------------------------------------------------------------
def _attention_kernel(qkv_ref, o_ref, attn_ref, *, scale):
    # qkv_ref: (3, 1, 1, S, dh)   o_ref: (1, 1, S, dh)   attn_ref: (1, 1, S, S)
    q = qkv_ref[0, 0, 0] * scale                         # fold 1/sqrt(dh) into q
    k = qkv_ref[1, 0, 0]
    v = qkv_ref[2, 0, 0]

    # Contract last dims directly -> no materialized k.T; f32 accumulation.
    scores = lax.dot_general(
        q, k, (((1,), (1,)), ((), ())),
        preferred_element_type=jnp.float32)              # (S, S) f32

    # Numerically-stable softmax in f32; reciprocal on the tiny (S,1) vector
    # is exact so the returned attention map matches PyTorch softmax.
    m = jnp.max(scores, axis=-1, keepdims=True)
    e = jnp.exp(scores - m)
    inv = 1.0 / jnp.sum(e, axis=-1, keepdims=True)
    p = e * inv                                          # (S, S)
    attn_ref[0, 0] = p.astype(attn_ref.dtype)

    out = jnp.dot(p.astype(v.dtype), v,
                  preferred_element_type=jnp.float32)    # (S, dh)
    o_ref[0, 0] = out.astype(o_ref.dtype)


def attention_pallas(qkv, num_heads):
    """qkv: (3, B, H, S, dh) -> (out (B, H, S, dh), attn_map (B, H, S, S))."""
    _, B, H, S, dh = qkv.shape
    kernel = functools.partial(_attention_kernel, scale=1.0 / math.sqrt(dh))
    return pl.pallas_call(
        kernel,
        out_shape=(
            jax.ShapeDtypeStruct((B, H, S, dh), qkv.dtype),
            jax.ShapeDtypeStruct((B, H, S, S), qkv.dtype),
        ),
        grid_spec=pltpu.PrefetchScalarGridSpec(
            num_scalar_prefetch=0,
            grid=(B, H),
            in_specs=[
                pl.BlockSpec((3, 1, 1, S, dh), lambda b, h: (0, b, h, 0, 0)),
            ],
            out_specs=[
                pl.BlockSpec((1, 1, S, dh), lambda b, h: (b, h, 0, 0)),
                pl.BlockSpec((1, 1, S, S), lambda b, h: (b, h, 0, 0)),
            ],
        ),
        compiler_params=pltpu.CompilerParams(
            dimension_semantics=("parallel", "parallel"),
            vmem_limit_bytes=_VMEM_LIMIT_BYTES),
    )(qkv)


# ---------------------------------------------------------------------------
# Module wrapper
# ---------------------------------------------------------------------------
def init_mha_params(key, d_model):
    """Deterministic init, PyTorch-Linear-style uniform(-1/sqrt(in), 1/sqrt(in))."""
    ks = jax.random.split(key, 8)
    lim = 1.0 / math.sqrt(d_model)

    def lin(kw, kb):
        w = jax.random.uniform(kw, (d_model, d_model), jnp.float32, -lim, lim)
        b = jax.random.uniform(kb, (d_model,), jnp.float32, -lim, lim)
        return w, b  # w is (out, in), PyTorch convention

    Wq, bq = lin(ks[0], ks[1])
    Wk, bk = lin(ks[2], ks[3])   # created but unused in forward (matches module)
    Wv, bv = lin(ks[4], ks[5])   # created but unused in forward (matches module)
    Wo, bo = lin(ks[6], ks[7])
    return {"Wq": Wq, "bq": bq, "Wk": Wk, "bk": bk,
            "Wv": Wv, "bv": bv, "Wo": Wo, "bo": bo}


def multi_head_attention(params, query, key, value, num_heads, mask=None):
    assert mask is None  # TODO(synk): mask path not implemented
    B, S, D = query.shape
    assert D % num_heads == 0
    dh = D // num_heads

    Wq_t = params["Wq"].T   # (in, out)
    Wo_t = params["Wo"].T

    # Fused QKV projection: the module applies W_q to query, key AND value,
    # so one row-tiled linear over the stacked inputs handles all three.
    x = jnp.stack([query, key, value], axis=0).reshape(3 * B * S, D)
    qkv = linear_pallas(x, Wq_t, params["bq"])

    # Head-major layout so each (batch, head) grid step gets a full-extent
    # (S, dh) tile (legal BlockSpec for any dh, no masked lane stores).
    qkv = qkv.reshape(3, B, S, num_heads, dh).transpose(0, 1, 3, 2, 4)

    out_h, attn_map = attention_pallas(qkv, num_heads)   # (B,H,S,dh), (B,H,S,S)

    out = out_h.transpose(0, 2, 1, 3).reshape(B * S, D)  # concat heads lane-dense
    out = linear_pallas(out, Wo_t, params["bo"]).reshape(B, S, D)
    return out, attn_map


# ---------------------------------------------------------------------------
# Reference (pure JAX) for a sanity check
# ---------------------------------------------------------------------------
def reference_mha(params, query, key, value, num_heads):
    B, S, D = query.shape
    Dh = D // num_heads

    def project(x):
        y = x @ params["Wq"].T + params["bq"]
        return y.reshape(B, S, num_heads, Dh).transpose(0, 2, 1, 3)

    q, k, v = project(query), project(key), project(value)
    scores = jnp.einsum("bhqd,bhkd->bhqk", q, k) / math.sqrt(Dh)
    p = jax.nn.softmax(scores, axis=-1)
    out = jnp.einsum("bhqk,bhkd->bhqd", p, v)
    out = out.transpose(0, 2, 1, 3).reshape(B, S, D)
    out = out @ params["Wo"].T + params["bo"]
    return out, p


if __name__ == "__main__":
    B, S, d_model, num_heads = 2, 8, 32, 4

    root = jax.random.PRNGKey(0)
    k_p, k_q, k_k, k_v = jax.random.split(root, 4)

    params = init_mha_params(k_p, d_model)
    query = jax.random.normal(k_q, (B, S, d_model), jnp.float32)
    key = jax.random.normal(k_k, (B, S, d_model), jnp.float32)
    value = jax.random.normal(k_v, (B, S, d_model), jnp.float32)

    out, attn_map = multi_head_attention(params, query, key, value, num_heads)
    out = jax.block_until_ready(out)
    attn_map = jax.block_until_ready(attn_map)

    ref_out, ref_attn = reference_mha(params, query, key, value, num_heads)
    assert out.shape == (B, S, d_model)
    assert attn_map.shape == (B, num_heads, S, S)
    assert jnp.allclose(out, ref_out, atol=1e-3, rtol=1e-3)
    assert jnp.allclose(attn_map, ref_attn, atol=1e-3, rtol=1e-3)

    print("KERNEL_OK")
</pallas_src>

<mosaic_0001>
module attributes {stable_mosaic.version = 11 : i64} {
  func.func @_linear_kernel(%arg0: i32, %arg1: memref<48x32xf32, #tpu.memory_space<vmem>>, %arg2: memref<32x32xf32, #tpu.memory_space<vmem>>, %arg3: memref<1x32xf32, #tpu.memory_space<vmem>>, %arg4: memref<48x32xf32, #tpu.memory_space<vmem>>) attributes {dimension_semantics = [#tpu.dimension_semantics<parallel>], iteration_bounds = array<i64: 1>, scalar_prefetch = 0 : i64, scratch_operands = 0 : i64, tpu.core_type = #tpu.core_type<tc>, window_params = [{transform_indices = @transform_0, window_bounds = array<i64: 48, 32>}, {pipeline_mode = #tpu.pipeline_mode<synchronous>, transform_indices = @transform_1, window_bounds = array<i64: 32, 32>}, {pipeline_mode = #tpu.pipeline_mode<synchronous>, transform_indices = @transform_2, window_bounds = array<i64: 1, 32>}, {transform_indices = @transform_3, window_bounds = array<i64: 48, 32>}]} {
    %c0 = arith.constant 0 : index
    %c0_0 = arith.constant 0 : index
    %0 = vector.load %arg1[%c0, %c0_0] : memref<48x32xf32, #tpu.memory_space<vmem>>, vector<48x32xf32>
    %c0_1 = arith.constant 0 : index
    %c0_2 = arith.constant 0 : index
    %1 = vector.load %arg2[%c0_1, %c0_2] : memref<32x32xf32, #tpu.memory_space<vmem>>, vector<32x32xf32>
    %cst = arith.constant dense<0.000000e+00> : vector<48x32xf32>
    %2 = tpu.matmul %0, %1, %cst {dimension_numbers = #tpu.dot_dimension_numbers<[1], [0], [0], [1], [0, 0, 1, 1], [], []>} : vector<48x32xf32>, vector<32x32xf32>, vector<48x32xf32> -> vector<48x32xf32>
    %c0_3 = arith.constant 0 : index
    %c0_4 = arith.constant 0 : index
    %3 = vector.load %arg3[%c0_3, %c0_4] : memref<1x32xf32, #tpu.memory_space<vmem>>, vector<1x32xf32>
    %4 = vector.broadcast %3 : vector<1x32xf32> to vector<48x32xf32>
    %5 = arith.addf %2, %4 : vector<48x32xf32>
    %c0_5 = arith.constant 0 : index
    %c0_6 = arith.constant 0 : index
    %6 = vector.load %arg4[%c0_5, %c0_6] : memref<48x32xf32, #tpu.memory_space<vmem>>, vector<48x32xf32>
    tpu.vector_store %arg4[%c0_5, %c0_6], %5 {strides = array<i32>} : memref<48x32xf32, #tpu.memory_space<vmem>>, vector<48x32xf32>,
    return
  }
  func.func @transform_0(%arg0: i32) -> (i32, i32) {
    %c0_i32 = arith.constant 0 : i32
    %c0_i32_0 = arith.constant 0 : i32
    return %arg0, %c0_i32 : i32, i32
  }
  func.func @transform_1(%arg0: i32) -> (i32, i32) {
    %c0_i32 = arith.constant 0 : i32
    %c0_i32_0 = arith.constant 0 : i32
    %c0_i32_1 = arith.constant 0 : i32
    return %c0_i32, %c0_i32_0 : i32, i32
  }
  func.func @transform_2(%arg0: i32) -> (i32, i32) {
    %c0_i32 = arith.constant 0 : i32
    %c0_i32_0 = arith.constant 0 : i32
    %c0_i32_1 = arith.constant 0 : i32
    return %c0_i32, %c0_i32_0 : i32, i32
  }
  func.func @transform_3(%arg0: i32) -> (i32, i32) {
    %c0_i32 = arith.constant 0 : i32
    %c0_i32_0 = arith.constant 0 : i32
    return %arg0, %c0_i32 : i32, i32
  }
}

</mosaic_0001>

<bundles_post_ra>
// kernel: tpu_custom_call.1
= control target key start
LH: loop header
LB: loop body
LE: loop exit
PB: predicated region body
PF: predicated region fallthrough
CT: control target
= control target key end

     0   :  { %vm31_vm0 = vcmask 261120   ;;  %s284_s1 = inlined_call_operand.vmem [shape: f32[32,32], index: 1, kind: input, shape index: {}]   ;;  %s285_s0 = inlined_call_operand.vmem [shape: f32[48,32], index: 0, kind: input, shape index: {}]   ;;  %s286_s2 = inlined_call_operand.vmem [shape: f32[1,32], index: 2, kind: input, shape index: {}]   ;;  %s287_s3 = inlined_call_operand.vmem [shape: f32[48,32], index: 3, kind: output, shape index: {}]  }
   0x1   :  { %v20_v0 = vld [vmem:[%s284_s1] sm:$0xff]  ;;  %v21_v1 = vld [vmem:[%s284_s1 + $0x8] sm:$0xff]  ;;  %v22_v2 = vld [vmem:[%s284_s1 + $0x10] sm:$0xff] }
   0x2   :  { %v189_v3 = vpack.c.bf16 %v21_v1, %v20_v0  ;;  %v23_v4 = vld [vmem:[%s284_s1 + $0x18] sm:$0xff]  ;;  %v16_v5 = vld [vmem:[%s285_s0 + $0x10] sm:$0xff]  ;;  %v14_v7 = vld [vmem:[%s285_s0] sm:$0xff] }
   0x3   :  { %v193_v6 = vpack.c.bf16 %v23_v4, %v22_v2  ;;  %183 = vmatprep.mubr.msk.f32.mxu1 %vm31_vm0, %v16_v5  ;;  %180 = vmatprep.mubr.msk.f32.mxu0 %vm31_vm0, %v14_v7  ;;  %v17_v8 = vld [vmem:[%s285_s0 + $0x18] sm:$0xff]  ;;  %v15_v9 = vld [vmem:[%s285_s0 + $0x8] sm:$0xff]  ;;  %v18_v10 = vld [vmem:[%s285_s0 + $0x20] sm:$0xff] }
   0x4   :  { %197 = vmatprep.subr.bf16.mxu1 %v189_v3  ;;  %190 = vmatprep.subr.bf16.mxu0 %v189_v3  ;;  %v19_v11 = vld [vmem:[%s285_s0 + $0x28] sm:$0xff]  ;;  %v155_v12 = vld [vmem:[%s286_s2] ss:$0 sm:$0xff] }
   0x5   :  { %199 = vmatpush3.bf16.msra.mxu1 %v189_v3  ;;  %192 = vmatpush3.bf16.msra.mxu0 %v189_v3 }
   0x6   :  { %198 = vmatprep.subr.bf16.mxu1 %v193_v6  ;;  %194 = vmatprep.subr.bf16.mxu0 %v193_v6 }
   0x9   :  { %200 = vmatpush3.bf16.msra.mxu1 %v193_v6  ;;  %196 = vmatpush3.bf16.msra.mxu0 %v193_v6 }
   0xc   :  { %184 = vmatmul.mubr.msk.f32.vlgmr.msra.gmra.mrb[0].mxu1 %vm31_vm0, %v17_v8  ;;  %181 = vmatmul.mubr.msk.f32.vlgmr.msra.gmra.mrb[0].mxu0 %vm31_vm0, %v15_v9 }
   0xd   :  { %186 = vmatprep.mubr.msk.f32.mxu1 %vm31_vm0, %v18_v10 }
  0x10   :  { %187 = vmatmul.mubr.msk.f32.gmra.mrb[2].mxu1 %vm31_vm0, %v19_v11 }
  0xdf   :  { %v185_v13 = vpop.f32.mrb[0].mxu1  ;;  %v182_v14 = vpop.f32.mrb[0].mxu0 }
  0xe0   :  { %v132_v15 = vadd.f32 %v185_v13, %v155_v12  ;;  %v126_v16 = vpop.f32.mrb[1].mxu1  ;;  %v122_v17 = vadd.f32 %v182_v14, %v155_v12  ;;  %v116_v18 = vpop.f32.mrb[1].mxu0 }
  0xe1   :  { %v127_v19 = vadd.f32 %v155_v12, %v126_v16  ;;  %v117_v20 = vadd.f32 %v155_v12, %v116_v18 }
  0xe2   :  { %148 = vst.msk [vmem:[%s287_s3 + $0x18] sm:$0xff] %vm31_vm0, %v132_v15  ;;  %146 = vst.msk [vmem:[%s287_s3 + $0x8] sm:$0xff] %vm31_vm0, %v122_v17 }
  0xe3   :  { %147 = vst.msk [vmem:[%s287_s3 + $0x10] sm:$0xff] %vm31_vm0, %v127_v19  ;;  %145 = vst.msk [vmem:[%s287_s3] sm:$0xff] %vm31_vm0, %v117_v20  ;;  %v188_v21 = vpop.f32.mrb[2].mxu1 }
  0xe4   :  { %v142_v22 = vadd.f32 %v188_v21, %v155_v12  ;;  %v136_v23 = vpop.f32.mrb[3].mxu1 }
  0xe5   :  { %v137_v24 = vadd.f32 %v155_v12, %v136_v23 }
  0xe6   :  { %150 = vst.msk [vmem:[%s287_s3 + $0x28] sm:$0xff] %vm31_vm0, %v142_v22 }
  0xe7   :  { %149 = vst.msk [vmem:[%s287_s3 + $0x20] sm:$0xff] %vm31_vm0, %v137_v24 }

</bundles_post_ra>
